<compile_context>
chip_gen: v5e
topology: v5e:2x2
jax: 0.10.0
libtpu: 0.0.40
codegen_flags: <defaults>
</compile_context>

<pallas_src>
import functools

import jax
import jax.numpy as jnp
from jax import lax
from jax.experimental import pallas as pl
from jax.experimental.pallas import tpu as pltpu

LANE = 128


def _round_up(v, m):
    return ((v + m - 1) // m) * m


def _pick_hw_tile(hw, cin, cf, bfeat_itemsize, budget_bytes=8 * 1024 * 1024):
    """Largest multiple-of-128 divisor of `hw` whose double-buffered tiles fit
    the budget. Budget is conservative so the same tile is safe on v7x
    (64 MiB physical VMEM) as well as v5e/v6e (128 MiB)."""
    if hw % LANE != 0:
        return hw                       # single full-extent tile
    best = LANE
    t = LANE
    while t <= hw:
        if hw % t == 0:
            per_step = cf * t * bfeat_itemsize + cin * t * 4
            if 2 * per_step <= budget_bytes:   # x2 for double buffering
                best = t
        t += LANE
    return best


def reid_kernel(x_ref, wconv_ref, bn2s_ref, bn2b_ref,
                whead_ref, bhead_ref, bn1s_ref, bn1b_ref, wcls_ref,
                bfeat_ref, pool_ref, feat_ref, prob_ref,
                pool_acc_ref, *, inv_hw):
    """One (batch row, HW tile) grid step. Grid = (N, HW // hw_tile)."""
    hw = pl.program_id(1)

    @pl.when(hw == 0)
    def _init():
        pool_acc_ref[...] = jnp.zeros_like(pool_acc_ref)

    # --- backbone stand-in: 1x1 conv (matmul) + folded BatchNorm2d + ReLU ---
    # TODO(synk): the real ResNet50 backbone (strided 3x3 convs, residual blocks,
    #             pretrained weights) is replaced by this synthetic 1x1-conv block.
    x = x_ref[...]                                        # (Cin, HWt), channels-first
    bb = lax.dot_general(wconv_ref[...], x,               # (Cf, Cin) @ (Cin, HWt)
                         (((1,), (0,)), ((), ())),
                         preferred_element_type=jnp.float32)        # (Cf, HWt)
    bb = bb * bn2s_ref[...] + bn2b_ref[...]               # per-channel (Cf, 1) bcast
    bb = jnp.maximum(bb, 0.0)
    bfeat_ref[...] = bb.astype(bfeat_ref.dtype)           # lane-dense (Cf, HWt) store

    # --- global average pooling: running f32 sum over HW tiles ---
    # (1, HWt) contracted against (Cf, HWt) on the (otherwise idle) MXU gives a
    # lane-dense (1, Cf) partial sum -> no transposes anywhere.
    ones_row = jnp.ones((1, bb.shape[1]), jnp.float32)
    pool_acc_ref[...] += lax.dot_general(ones_row, bb,
                                         (((1,), (1,)), ((), ())),
                                         preferred_element_type=jnp.float32)

    # --- head + classifier: only once per batch row, on the last HW tile ---
    @pl.when(hw == pl.num_programs(1) - 1)
    def _finalize():
        pooled = pool_acc_ref[...] * inv_hw               # (1, Cf)
        pool_ref[...] = pooled
        # embedding head: Linear + folded BatchNorm1d (eval) + ReLU (dropout = id)
        h = jnp.dot(pooled, whead_ref[...],
                    preferred_element_type=jnp.float32) + bhead_ref[...]   # (1, Epad)
        h = jnp.maximum(h * bn1s_ref[...] + bn1b_ref[...], 0.0)
        feat_ref[...] = h
        # classifier: Linear(E -> num_classes), bias=False
        prob_ref[...] = jnp.dot(h, wcls_ref[...],
                                preferred_element_type=jnp.float32)        # (1, Kpad)


def reid_forward(x_nchw, params, *, hw_tile=None, bfeat_dtype=jnp.float32):
    N, Cin, H, W = x_nchw.shape
    HW = H * W
    Cf = params["wconv_t"].shape[0]
    E = params["whead"].shape[1]
    K = params["wcls"].shape[1]
    E_pad = _round_up(E, LANE)
    K_pad = _round_up(K, LANE)

    if hw_tile is None:
        hw_tile = _pick_hw_tile(HW, Cin, Cf, jnp.dtype(bfeat_dtype).itemsize)
    assert HW % hw_tile == 0, (HW, hw_tile)
    n_hw = HW // hw_tile

    # NCHW kept channels-first: pure reshape, no HBM transpose pass.
    x = x_nchw.reshape(N, Cin, HW)

    f32 = jnp.float32
    # Pad head/classifier params to lane width 128 so feat/prob stores are
    # lane-dense unmasked vst; padded columns/rows are exact zeros.
    whead_p = jnp.zeros((Cf, E_pad), f32).at[:, :E].set(params["whead"].astype(f32))
    bhead_p = jnp.zeros((1, E_pad), f32).at[:, :E].set(
        params["bhead"].reshape(1, E).astype(f32))
    bn1s_p = jnp.ones((1, E_pad), f32).at[:, :E].set(
        params["bn1d_scale"].reshape(1, E).astype(f32))
    bn1b_p = jnp.zeros((1, E_pad), f32).at[:, :E].set(
        params["bn1d_shift"].reshape(1, E).astype(f32))
    wcls_p = jnp.zeros((E_pad, K_pad), f32).at[:E, :K].set(params["wcls"].astype(f32))

    const2 = lambda n, k: (0, 0)

    grid_spec = pltpu.PrefetchScalarGridSpec(
        num_scalar_prefetch=0,
        grid=(N, n_hw),
        in_specs=[
            pl.BlockSpec((pl.Squeezed(), Cin, hw_tile), lambda n, k: (n, 0, k)),  # x
            pl.BlockSpec((Cf, Cin), const2),          # wconv_t
            pl.BlockSpec((Cf, 1), const2),            # bn2d scale
            pl.BlockSpec((Cf, 1), const2),            # bn2d shift
            pl.BlockSpec((Cf, E_pad), const2),        # whead (padded)
            pl.BlockSpec((1, E_pad), const2),         # bhead (padded)
            pl.BlockSpec((1, E_pad), const2),         # bn1d scale (padded, ones)
            pl.BlockSpec((1, E_pad), const2),         # bn1d shift (padded)
            pl.BlockSpec((E_pad, K_pad), const2),     # wcls (padded)
        ],
        out_specs=(
            pl.BlockSpec((pl.Squeezed(), Cf, hw_tile), lambda n, k: (n, 0, k)),   # bfeat
            pl.BlockSpec((pl.Squeezed(), 1, Cf), lambda n, k: (n, 0, 0)),         # pooling
            pl.BlockSpec((pl.Squeezed(), 1, E_pad), lambda n, k: (n, 0, 0)),      # feat
            pl.BlockSpec((pl.Squeezed(), 1, K_pad), lambda n, k: (n, 0, 0)),      # prob
        ),
        scratch_shapes=[pltpu.VMEM((1, Cf), jnp.float32)],                        # pooled sum
    )

    out_shapes = (
        jax.ShapeDtypeStruct((N, Cf, HW), bfeat_dtype),   # backbone_feat (channels-first)
        jax.ShapeDtypeStruct((N, 1, Cf), jnp.float32),    # pooling
        jax.ShapeDtypeStruct((N, 1, E_pad), jnp.float32), # feat (lane-padded)
        jax.ShapeDtypeStruct((N, 1, K_pad), jnp.float32), # prob (lane-padded)
    )

    bfeat, pooled, feat_p, prob_p = pl.pallas_call(
        functools.partial(reid_kernel, inv_hw=float(1.0 / HW)),
        out_shape=out_shapes,
        grid_spec=grid_spec,
        compiler_params=pltpu.CompilerParams(
            dimension_semantics=("parallel", "arbitrary"),   # batch sharded on v7x 2 TCs
            vmem_limit_bytes=32 * 1024 * 1024,               # safe on v5e/v6e/v7x
        ),
    )(x, params["wconv_t"], params["bn2d_scale"], params["bn2d_shift"],
      whead_p, bhead_p, bn1s_p, bn1b_p, wcls_p)

    return {
        "backbone_feat": bfeat.reshape(N, Cf, H, W),      # already NCHW: free reshape
        "pooling": pooled.reshape(N, Cf),
        "feat": feat_p.reshape(N, E_pad)[:, :E],
        "prob": prob_p.reshape(N, K_pad)[:, :K],
    }


def make_params(key, cin, cfeat, embed_feat, num_classes):
    ks = jax.random.split(key, 7)
    eps = 1e-5

    # backbone 1x1 conv (kaiming fan_out-ish), no bias; BatchNorm2d folded (eval)
    wconv_t = jax.random.normal(ks[0], (cfeat, cin), jnp.float32) * (2.0 / cfeat) ** 0.5
    gamma2 = jnp.ones((cfeat,), jnp.float32)
    beta2 = jnp.zeros((cfeat,), jnp.float32)
    rmean2 = jax.random.normal(ks[1], (cfeat,), jnp.float32) * 0.1
    rvar2 = jnp.abs(jax.random.normal(ks[2], (cfeat,), jnp.float32)) * 0.1 + 1.0
    inv2 = gamma2 / jnp.sqrt(rvar2 + eps)
    bn2d_scale = inv2.reshape(cfeat, 1)
    bn2d_shift = (beta2 - rmean2 * inv2).reshape(cfeat, 1)

    # embedding head: Linear(cfeat, embed_feat) (weight ~ N(0, 0.001), bias 0),
    # BatchNorm1d(embed_feat) folded (eval mode)
    whead = (jax.random.normal(ks[3], (embed_feat, cfeat), jnp.float32) * 0.001).T
    bhead = jnp.zeros((1, embed_feat), jnp.float32)
    gamma1 = jnp.ones((embed_feat,), jnp.float32)
    beta1 = jnp.zeros((embed_feat,), jnp.float32)
    rmean1 = jax.random.normal(ks[4], (embed_feat,), jnp.float32) * 0.01
    rvar1 = jnp.abs(jax.random.normal(ks[5], (embed_feat,), jnp.float32)) * 0.1 + 1.0
    inv1 = gamma1 / jnp.sqrt(rvar1 + eps)
    bn1d_scale = inv1.reshape(1, embed_feat)
    bn1d_shift = (beta1 - rmean1 * inv1).reshape(1, embed_feat)

    # classifier: Linear(embed_feat, num_classes, bias=False), weight ~ N(0, 0.001)
    wcls = (jax.random.normal(ks[6], (num_classes, embed_feat), jnp.float32) * 0.001).T

    return {
        "wconv_t": wconv_t, "bn2d_scale": bn2d_scale, "bn2d_shift": bn2d_shift,
        "whead": whead, "bhead": bhead,
        "bn1d_scale": bn1d_scale, "bn1d_shift": bn1d_shift,
        "wcls": wcls,
    }


def reid_forward_ref(x_nchw, params):
    """Pure-JAX reference of the same forward, for correctness checking."""
    N, Cin, H, W = x_nchw.shape
    x = x_nchw.reshape(N, Cin, H * W)
    bb = jnp.einsum("fc,nck->nfk", params["wconv_t"], x)
    bb = jnp.maximum(bb * params["bn2d_scale"][None] + params["bn2d_shift"][None], 0.0)
    pooled = jnp.mean(bb, axis=2)                        # (N, Cf)
    h = pooled @ params["whead"] + params["bhead"]
    h = jnp.maximum(h * params["bn1d_scale"] + params["bn1d_shift"], 0.0)
    prob = h @ params["wcls"]
    backbone_feat = bb.reshape(N, -1, H, W)
    return {"backbone_feat": backbone_feat, "pooling": pooled, "feat": h, "prob": prob}


if __name__ == "__main__":
    N, Cin, H, W = 2, 4, 16, 16      # input image batch (NCHW, like PyTorch)
    Cf = 64                          # backbone.num_features (stand-in)
    E = 32                           # embed_feat
    K = 16                           # num_classes

    key = jax.random.PRNGKey(0)
    kx, kp = jax.random.split(key)
    x = jax.random.normal(kx, (N, Cin, H, W), jnp.float32)
    params = make_params(kp, Cin, Cf, E, K)

    # hw_tile=128 -> grid (N=2, HW tiles=2): exercises the tiled pooling reduction.
    out = reid_forward(x, params, hw_tile=128)
    out = jax.tree_util.tree_map(jax.block_until_ready, out)

    ref = reid_forward_ref(x, params)
    for name in ("backbone_feat", "pooling", "feat", "prob"):
        assert out[name].shape == ref[name].shape, name
        assert jnp.allclose(out[name], ref[name], atol=1e-4, rtol=1e-4), name

    print("KERNEL_OK")
</pallas_src>

<mosaic_0001>
module attributes {stable_mosaic.version = 11 : i64} {
  func.func @reid_kernel(%arg0: i32, %arg1: i32, %arg2: memref<1x4x128xf32, #tpu.memory_space<vmem>>, %arg3: memref<64x4xf32, #tpu.memory_space<vmem>>, %arg4: memref<64x1xf32, #tpu.memory_space<vmem>>, %arg5: memref<64x1xf32, #tpu.memory_space<vmem>>, %arg6: memref<64x128xf32, #tpu.memory_space<vmem>>, %arg7: memref<1x128xf32, #tpu.memory_space<vmem>>, %arg8: memref<1x128xf32, #tpu.memory_space<vmem>>, %arg9: memref<1x128xf32, #tpu.memory_space<vmem>>, %arg10: memref<128x128xf32, #tpu.memory_space<vmem>>, %arg11: memref<1x64x128xf32, #tpu.memory_space<vmem>>, %arg12: memref<1x1x64xf32, #tpu.memory_space<vmem>>, %arg13: memref<1x1x128xf32, #tpu.memory_space<vmem>>, %arg14: memref<1x1x128xf32, #tpu.memory_space<vmem>>, %arg15: memref<1x64xf32, #tpu.memory_space<vmem>>) attributes {dimension_semantics = [#tpu.dimension_semantics<parallel>, #tpu.dimension_semantics<arbitrary>], iteration_bounds = array<i64: 2, 2>, scalar_prefetch = 0 : i64, scratch_operands = 1 : i64, tpu.core_type = #tpu.core_type<tc>, window_params = [{transform_indices = @transform_0, window_bounds = array<i64: 1, 4, 128>}, {pipeline_mode = #tpu.pipeline_mode<synchronous>, transform_indices = @transform_1, window_bounds = array<i64: 64, 4>}, {pipeline_mode = #tpu.pipeline_mode<synchronous>, transform_indices = @transform_2, window_bounds = array<i64: 64, 1>}, {pipeline_mode = #tpu.pipeline_mode<synchronous>, transform_indices = @transform_3, window_bounds = array<i64: 64, 1>}, {pipeline_mode = #tpu.pipeline_mode<synchronous>, transform_indices = @transform_4, window_bounds = array<i64: 64, 128>}, {pipeline_mode = #tpu.pipeline_mode<synchronous>, transform_indices = @transform_5, window_bounds = array<i64: 1, 128>}, {pipeline_mode = #tpu.pipeline_mode<synchronous>, transform_indices = @transform_6, window_bounds = array<i64: 1, 128>}, {pipeline_mode = #tpu.pipeline_mode<synchronous>, transform_indices = @transform_7, window_bounds = array<i64: 1, 128>}, {pipeline_mode = #tpu.pipeline_mode<synchronous>, transform_indices = @transform_8, window_bounds = array<i64: 128, 128>}, {transform_indices = @transform_9, window_bounds = array<i64: 1, 64, 128>}, {transform_indices = @transform_10, window_bounds = array<i64: 1, 1, 64>}, {transform_indices = @transform_11, window_bounds = array<i64: 1, 1, 128>}, {transform_indices = @transform_12, window_bounds = array<i64: 1, 1, 128>}]} {
    %c0_i32 = arith.constant 0 : i32
    %0 = arith.cmpi eq, %arg1, %c0_i32 : i32
    %1 = arith.extui %0 : i1 to i32
    %c0_i32_0 = arith.constant 0 : i32
    %2 = arith.cmpi ne, %1, %c0_i32_0 : i32
    scf.if %2 {
      %cst_20 = arith.constant 0.000000e+00 : f32
      %26 = vector.broadcast %cst_20 : f32 to vector<1x64xf32>
      %c0_21 = arith.constant 0 : index
      %c0_22 = arith.constant 0 : index
      %27 = vector.load %arg15[%c0_21, %c0_22] : memref<1x64xf32, #tpu.memory_space<vmem>>, vector<1x64xf32>
      tpu.vector_store %arg15[%c0_21, %c0_22], %26 {strides = array<i32>} : memref<1x64xf32, #tpu.memory_space<vmem>>, vector<1x64xf32>,
    } else {
    }
    %c0 = arith.constant 0 : index
    %c0_1 = arith.constant 0 : index
    %c0_2 = arith.constant 0 : index
    %3 = vector.load %arg2[%c0, %c0_1, %c0_2] : memref<1x4x128xf32, #tpu.memory_space<vmem>>, vector<1x4x128xf32>
    %4 = vector.shape_cast %3 : vector<1x4x128xf32> to vector<4x128xf32>
    %c0_3 = arith.constant 0 : index
    %c0_4 = arith.constant 0 : index
    %5 = vector.load %arg3[%c0_3, %c0_4] : memref<64x4xf32, #tpu.memory_space<vmem>>, vector<64x4xf32>
    %cst = arith.constant dense<0.000000e+00> : vector<64x128xf32>
    %6 = tpu.matmul %5, %4, %cst {dimension_numbers = #tpu.dot_dimension_numbers<[1], [0], [0], [1], [0, 0, 1, 1], [], []>} : vector<64x4xf32>, vector<4x128xf32>, vector<64x128xf32> -> vector<64x128xf32>
    %c0_5 = arith.constant 0 : index
    %c0_6 = arith.constant 0 : index
    %7 = vector.load %arg4[%c0_5, %c0_6] : memref<64x1xf32, #tpu.memory_space<vmem>>, vector<64x1xf32>
    %8 = vector.broadcast %7 : vector<64x1xf32> to vector<64x128xf32>
    %9 = arith.mulf %6, %8 : vector<64x128xf32>
    %c0_7 = arith.constant 0 : index
    %c0_8 = arith.constant 0 : index
    %10 = vector.load %arg5[%c0_7, %c0_8] : memref<64x1xf32, #tpu.memory_space<vmem>>, vector<64x1xf32>
    %11 = vector.broadcast %10 : vector<64x1xf32> to vector<64x128xf32>
    %12 = arith.addf %9, %11 : vector<64x128xf32>
    %cst_9 = arith.constant 0.000000e+00 : f32
    %13 = vector.broadcast %cst_9 : f32 to vector<64x128xf32>
    %14 = arith.maximumf %12, %13 : vector<64x128xf32>
    %c0_10 = arith.constant 0 : index
    %c0_11 = arith.constant 0 : index
    %c0_12 = arith.constant 0 : index
    %15 = vector.load %arg11[%c0_10, %c0_11, %c0_12] : memref<1x64x128xf32, #tpu.memory_space<vmem>>, vector<1x64x128xf32>
    %16 = vector.shape_cast %15 : vector<1x64x128xf32> to vector<64x128xf32>
    %17 = vector.shape_cast %14 : vector<64x128xf32> to vector<1x64x128xf32>
    tpu.vector_store %arg11[%c0_10, %c0_11, %c0_12], %17 {strides = array<i32>} : memref<1x64x128xf32, #tpu.memory_space<vmem>>, vector<1x64x128xf32>,
    %cst_13 = arith.constant 1.000000e+00 : f32
    %18 = vector.broadcast %cst_13 : f32 to vector<1x128xf32>
    %c0_14 = arith.constant 0 : index
    %c0_15 = arith.constant 0 : index
    %19 = vector.load %arg15[%c0_14, %c0_15] : memref<1x64xf32, #tpu.memory_space<vmem>>, vector<1x64xf32>
    %cst_16 = arith.constant dense<0.000000e+00> : vector<1x64xf32>
    %20 = tpu.matmul %18, %14, %cst_16 {dimension_numbers = #tpu.dot_dimension_numbers<[1], [1], [0], [0], [0, 0, 1, 0], [], []>} : vector<1x128xf32>, vector<64x128xf32>, vector<1x64xf32> -> vector<1x64xf32>
    %21 = arith.addf %19, %20 : vector<1x64xf32>
    %c0_17 = arith.constant 0 : index
    %c0_18 = arith.constant 0 : index
    %22 = vector.load %arg15[%c0_17, %c0_18] : memref<1x64xf32, #tpu.memory_space<vmem>>, vector<1x64xf32>
    tpu.vector_store %arg15[%c0_17, %c0_18], %21 {strides = array<i32>} : memref<1x64xf32, #tpu.memory_space<vmem>>, vector<1x64xf32>,
    %c1_i32 = arith.constant 1 : i32
    %23 = arith.cmpi eq, %arg1, %c1_i32 : i32
    %24 = arith.extui %23 : i1 to i32
    %c0_i32_19 = arith.constant 0 : i32
    %25 = arith.cmpi ne, %24, %c0_i32_19 : i32
    scf.if %25 {
      %c0_20 = arith.constant 0 : index
      %c0_21 = arith.constant 0 : index
      %26 = vector.load %arg15[%c0_20, %c0_21] : memref<1x64xf32, #tpu.memory_space<vmem>>, vector<1x64xf32>
      %cst_22 = arith.constant 3.906250e-03 : f32
      %27 = vector.broadcast %cst_22 : f32 to vector<1x64xf32>
      %28 = arith.mulf %26, %27 : vector<1x64xf32>
      %c0_23 = arith.constant 0 : index
      %c0_24 = arith.constant 0 : index
      %c0_25 = arith.constant 0 : index
      %29 = vector.load %arg12[%c0_23, %c0_24, %c0_25] : memref<1x1x64xf32, #tpu.memory_space<vmem>>, vector<1x1x64xf32>
      %30 = vector.shape_cast %29 : vector<1x1x64xf32> to vector<1x64xf32>
      %31 = vector.shape_cast %28 : vector<1x64xf32> to vector<1x1x64xf32>
      tpu.vector_store %arg12[%c0_23, %c0_24, %c0_25], %31 {strides = array<i32>} : memref<1x1x64xf32, #tpu.memory_space<vmem>>, vector<1x1x64xf32>,
      %c0_26 = arith.constant 0 : index
      %c0_27 = arith.constant 0 : index
      %32 = vector.load %arg6[%c0_26, %c0_27] : memref<64x128xf32, #tpu.memory_space<vmem>>, vector<64x128xf32>
      %cst_28 = arith.constant dense<0.000000e+00> : vector<1x128xf32>
      %33 = tpu.matmul %28, %32, %cst_28 {dimension_numbers = #tpu.dot_dimension_numbers<[1], [0], [0], [1], [0, 0, 1, 1], [], []>} : vector<1x64xf32>, vector<64x128xf32>, vector<1x128xf32> -> vector<1x128xf32>
      %c0_29 = arith.constant 0 : index
      %c0_30 = arith.constant 0 : index
      %34 = vector.load %arg7[%c0_29, %c0_30] : memref<1x128xf32, #tpu.memory_space<vmem>>, vector<1x128xf32>
      %35 = arith.addf %33, %34 : vector<1x128xf32>
      %c0_31 = arith.constant 0 : index
      %c0_32 = arith.constant 0 : index
      %36 = vector.load %arg8[%c0_31, %c0_32] : memref<1x128xf32, #tpu.memory_space<vmem>>, vector<1x128xf32>
      %37 = arith.mulf %35, %36 : vector<1x128xf32>
      %c0_33 = arith.constant 0 : index
      %c0_34 = arith.constant 0 : index
      %38 = vector.load %arg9[%c0_33, %c0_34] : memref<1x128xf32, #tpu.memory_space<vmem>>, vector<1x128xf32>
      %39 = arith.addf %37, %38 : vector<1x128xf32>
      %cst_35 = arith.constant 0.000000e+00 : f32
      %40 = vector.broadcast %cst_35 : f32 to vector<1x128xf32>
      %41 = arith.maximumf %39, %40 : vector<1x128xf32>
      %c0_36 = arith.constant 0 : index
      %c0_37 = arith.constant 0 : index
      %c0_38 = arith.constant 0 : index
      %42 = vector.load %arg13[%c0_36, %c0_37, %c0_38] : memref<1x1x128xf32, #tpu.memory_space<vmem>>, vector<1x1x128xf32>
      %43 = vector.shape_cast %42 : vector<1x1x128xf32> to vector<1x128xf32>
      %44 = vector.shape_cast %41 : vector<1x128xf32> to vector<1x1x128xf32>
      tpu.vector_store %arg13[%c0_36, %c0_37, %c0_38], %44 {strides = array<i32>} : memref<1x1x128xf32, #tpu.memory_space<vmem>>, vector<1x1x128xf32>,
      %c0_39 = arith.constant 0 : index
      %c0_40 = arith.constant 0 : index
      %45 = vector.load %arg10[%c0_39, %c0_40] : memref<128x128xf32, #tpu.memory_space<vmem>>, vector<128x128xf32>
      %cst_41 = arith.constant dense<0.000000e+00> : vector<1x128xf32>
      %46 = tpu.matmul %41, %45, %cst_41 {dimension_numbers = #tpu.dot_dimension_numbers<[1], [0], [0], [1], [0, 0, 1, 1], [], []>} : vector<1x128xf32>, vector<128x128xf32>, vector<1x128xf32> -> vector<1x128xf32>
      %c0_42 = arith.constant 0 : index
      %c0_43 = arith.constant 0 : index
      %c0_44 = arith.constant 0 : index
      %47 = vector.load %arg14[%c0_42, %c0_43, %c0_44] : memref<1x1x128xf32, #tpu.memory_space<vmem>>, vector<1x1x128xf32>
      %48 = vector.shape_cast %47 : vector<1x1x128xf32> to vector<1x128xf32>
      %49 = vector.shape_cast %46 : vector<1x128xf32> to vector<1x1x128xf32>
      tpu.vector_store %arg14[%c0_42, %c0_43, %c0_44], %49 {strides = array<i32>} : memref<1x1x128xf32, #tpu.memory_space<vmem>>, vector<1x1x128xf32>,
    } else {
    }
    return
  }
  func.func @transform_0(%arg0: i32, %arg1: i32) -> (i32, i32, i32) {
    %c0_i32 = arith.constant 0 : i32
    %c0_i32_0 = arith.constant 0 : i32
    return %arg0, %c0_i32, %arg1 : i32, i32, i32
  }
  func.func @transform_1(%arg0: i32, %arg1: i32) -> (i32, i32) {
    %c0_i32 = arith.constant 0 : i32
    %c0_i32_0 = arith.constant 0 : i32
    %c0_i32_1 = arith.constant 0 : i32
    return %c0_i32, %c0_i32_0 : i32, i32
  }
  func.func @transform_2(%arg0: i32, %arg1: i32) -> (i32, i32) {
    %c0_i32 = arith.constant 0 : i32
    %c0_i32_0 = arith.constant 0 : i32
    %c0_i32_1 = arith.constant 0 : i32
    return %c0_i32, %c0_i32_0 : i32, i32
  }
  func.func @transform_3(%arg0: i32, %arg1: i32) -> (i32, i32) {
    %c0_i32 = arith.constant 0 : i32
    %c0_i32_0 = arith.constant 0 : i32
    %c0_i32_1 = arith.constant 0 : i32
    return %c0_i32, %c0_i32_0 : i32, i32
  }
  func.func @transform_4(%arg0: i32, %arg1: i32) -> (i32, i32) {
    %c0_i32 = arith.constant 0 : i32
    %c0_i32_0 = arith.constant 0 : i32
    %c0_i32_1 = arith.constant 0 : i32
    return %c0_i32, %c0_i32_0 : i32, i32
  }
  func.func @transform_5(%arg0: i32, %arg1: i32) -> (i32, i32) {
    %c0_i32 = arith.constant 0 : i32
    %c0_i32_0 = arith.constant 0 : i32
    %c0_i32_1 = arith.constant 0 : i32
    return %c0_i32, %c0_i32_0 : i32, i32
  }
  func.func @transform_6(%arg0: i32, %arg1: i32) -> (i32, i32) {
    %c0_i32 = arith.constant 0 : i32
    %c0_i32_0 = arith.constant 0 : i32
    %c0_i32_1 = arith.constant 0 : i32
    return %c0_i32, %c0_i32_0 : i32, i32
  }
  func.func @transform_7(%arg0: i32, %arg1: i32) -> (i32, i32) {
    %c0_i32 = arith.constant 0 : i32
    %c0_i32_0 = arith.constant 0 : i32
    %c0_i32_1 = arith.constant 0 : i32
    return %c0_i32, %c0_i32_0 : i32, i32
  }
  func.func @transform_8(%arg0: i32, %arg1: i32) -> (i32, i32) {
    %c0_i32 = arith.constant 0 : i32
    %c0_i32_0 = arith.constant 0 : i32
    %c0_i32_1 = arith.constant 0 : i32
    return %c0_i32, %c0_i32_0 : i32, i32
  }
  func.func @transform_9(%arg0: i32, %arg1: i32) -> (i32, i32, i32) {
    %c0_i32 = arith.constant 0 : i32
    %c0_i32_0 = arith.constant 0 : i32
    return %arg0, %c0_i32, %arg1 : i32, i32, i32
  }
  func.func @transform_10(%arg0: i32, %arg1: i32) -> (i32, i32, i32) {
    %c0_i32 = arith.constant 0 : i32
    %c0_i32_0 = arith.constant 0 : i32
    %c0_i32_1 = arith.constant 0 : i32
    return %arg0, %c0_i32, %c0_i32_0 : i32, i32, i32
  }
  func.func @transform_11(%arg0: i32, %arg1: i32) -> (i32, i32, i32) {
    %c0_i32 = arith.constant 0 : i32
    %c0_i32_0 = arith.constant 0 : i32
    %c0_i32_1 = arith.constant 0 : i32
    return %arg0, %c0_i32, %c0_i32_0 : i32, i32, i32
  }
  func.func @transform_12(%arg0: i32, %arg1: i32) -> (i32, i32, i32) {
    %c0_i32 = arith.constant 0 : i32
    %c0_i32_0 = arith.constant 0 : i32
    %c0_i32_1 = arith.constant 0 : i32
    return %arg0, %c0_i32, %c0_i32_0 : i32, i32, i32
  }
}

</mosaic_0001>

<bundles_post_ra>
// kernel: tpu_custom_call.1
= control target key start
LH: loop header
LB: loop body
LE: loop exit
PB: predicated region body
PF: predicated region fallthrough
CT: control target
= control target key end

     0   :  { %s1942_s0 = inlined_call_operand.hbm [shape: f32[2,4,256], index: 0, kind: input, shape index: {}]   ;;  %s1943_s1 = inlined_call_operand.vmem [shape: f32[64,4], index: 1, kind: input, shape index: {}]   ;;  %s1944_s2 = inlined_call_operand.vmem [shape: f32[64,1], index: 2, kind: input, shape index: {}]   ;;  %s1945_s3 = inlined_call_operand.vmem [shape: f32[64,1], index: 3, kind: input, shape index: {}]   ;;  %s1946_s4 = inlined_call_operand.vmem [shape: f32[64,128], index: 4, kind: input, shape index: {}]   ;;  %s1947_s5 = inlined_call_operand.vmem [shape: f32[1,128], index: 5, kind: input, shape index: {}]   ;;  %s1948_s6 = inlined_call_operand.vmem [shape: f32[1,128], index: 6, kind: input, shape index: {}]   ;;  %s1949_s7 = inlined_call_operand.vmem [shape: f32[1,128], index: 7, kind: input, shape index: {}]   ;;  %s1950_s8 = inlined_call_operand.vmem [shape: f32[128,128], index: 8, kind: input, shape index: {}]   ;;  %s1951_s9 = inlined_call_operand.hbm [shape: f32[2,64,256], index: 9, kind: output, shape index: {0}]   ;;  %s1952_s10 = inlined_call_operand.hbm [shape: f32[2,1,64], index: 10, kind: output, shape index: {1}]   ;;  %s1953_s11 = inlined_call_operand.hbm [shape: f32[2,1,128], index: 11, kind: output, shape index: {2}]   ;;  %s1954_s12 = inlined_call_operand.hbm [shape: f32[2,1,128], index: 12, kind: output, shape index: {3}]  }
   0x1   :  { %1974 = sst [smem:[#allocation29_spill]] %s1942_s0 }
   0x2   :  { %1975 = sst [smem:[#allocation30_spill]] %s1943_s1 }
   0x3   :  { %1976 = sst [smem:[#allocation31_spill]] %s1944_s2 }
   0x4   :  { %1977 = sst [smem:[#allocation32_spill]] %s1945_s3 }
   0x5   :  { %1978 = sst [smem:[#allocation33_spill]] %s1946_s4 }
   0x6   :  { %1979 = sst [smem:[#allocation34_spill]] %s1947_s5 }
   0x7   :  { %1980 = sst [smem:[#allocation35_spill]] %s1948_s6 }
   0x8   :  { %1981 = sst [smem:[#allocation36_spill]] %s1949_s7 }
   0x9   :  { %1982 = sst [smem:[#allocation37_spill]] %s1950_s8 }
   0xa   :  { %1983 = sst [smem:[#allocation38_spill]] %s1951_s9 }
   0xb   :  { %1984 = sst [smem:[#allocation39_spill]] %s1952_s10 }
   0xc   :  { %1985 = sst [smem:[#allocation40_spill]] %s1953_s11 }
   0xd   :  { %1986 = sst [smem:[#allocation41_spill]] %s1954_s12 }
   0xe   :  { %18 = vsyncpa [#allocation4], 0 }
   0xf   :  { %20 = vsyncpa [#allocation4 + $0x1], 0 }
  0x10   :  { %21 = vsyncpa [#allocation5], 0 }
  0x11   :  { %23 = vsyncpa [#allocation5 + $0x1], 0 }
  0x12   :  { %24 = vsyncpa [#allocation8], 0 }
  0x13   :  { %26 = vsyncpa [#allocation8 + $0x1], 0 }
  0x14   :  { %27 = vsyncpa [#allocation11], 0 }
  0x15   :  { %29 = vsyncpa [#allocation11 + $0x1], 0  ;;  %s1502_s21 = smov 0   ;;  %s1504_s22 = smov 0  }
  0x16   :  { %s1506_s23 = smov 0   ;;  %s1508_s24 = smov 0  }
  0x17   :  { %s1510_s25 = smov 0   ;;  %s1512_s26 = smov 0  }
  0x18   :  { %s1514_s27 = smov 0   ;;  %s1516_s28 = smov 0  }
  0x19   :  { %s1518_s29 = smov 0   ;;  %s1520_s30 = smov 0  }
  0x1a   :  { %s1522_s13 = smov 0  }
  0x1b LB: > { %1987 = sst [smem:[#allocation16_spill]] %s1389_s21  ;;  %s1558_s14 = sadd.s32 4294967295, %s1429_s13   ;;  %s1429_s13 = sphi %s1522_s13, %s35_s13   ;;  %s1425_s30 = sphi %s1520_s30, %s2038_s30   ;;  %s1421_s29 = sphi %s1518_s29, %s2037_s29   ;;  %s1417_s28 = sphi %s1516_s28, %s2036_s28   ;;  %s1413_s27 = sphi %s1514_s27, %s2035_s27   ;;  %s1409_s26 = sphi %s1512_s26, %s2043_s26   ;;  %s1405_s25 = sphi %s1510_s25, %s2042_s25   ;;  %s1401_s24 = sphi %s1508_s24, %s2041_s24   ;;  %s1397_s23 = sphi %s1506_s23, %s2033_s23   ;;  %s1393_s22 = sphi %s1504_s22, %s2040_s22   ;;  %s1389_s21 = sphi %s1502_s21, %s2039_s21  }
  0x1c   : > { %1988 = sst [smem:[#allocation17_spill]] %s1397_s23  ;;  %s44_s16 = sadd.s32 1, %s1421_s29 }
  0x1d   : > { %1989 = sst [smem:[#allocation18_spill]] %s1401_s24  ;;  %s47_s17 = sadd.s32 1, %s1425_s30 }
  0x1e   : > { %1990 = sst [smem:[#allocation19_spill]] %s1417_s28  ;;  %p45_p0 = scmp.ge.s32.totalorder %s44_s16, 2 }
  0x1f   : > { %1991 = sst [smem:[#allocation20_spill]] %s1421_s29  ;;  %s56_s18 = sadd.s32 1, %s1409_s26 }
  0x20   : > { %1992 = sst [smem:[#allocation21_spill]] %s1425_s30  ;;  %p63_p1 = scmp.ne.s32.totalorder %s1409_s26, %s1405_s25 }
  0x21   : > { %p64_p2 = scmp.eq.s32.totalorder %s1429_s13, 0  ;;  %s2045_s16 = smov (%p45_p0, %s44_s16), 0 }
  0x22   : > { %1993 = sst [smem:[#allocation22_spill]] %s2045_s16  ;;  %s2047_s17 = smov (!%p45_p0, %s47_s17), %s1425_s30 }
  0x23   : > { %s52_s19 = ssub.s32 %s1421_s29, %s2045_s16  ;;  %p1572_p3 = por %p64_p2, %p63_p1 }
  0x24   : > { %p49_p4 = scmp.ge.s32.totalorder %s2047_s17, 2  ;;  %p69_p5 = scmp.ne.s32.totalorder %s1405_s25, %s1401_s24 }
  0x25   : > { %p70_p6 = scmp.eq.s32.totalorder %s1558_s14, 0  ;;  %p263_p7 = scmp.eq.s32.totalorder %s1558_s14, 3 }
  0x26   : > { %s2049_s17 = smov (%p49_p4, %s2047_s17), 0  ;;  %s1999_s12 = sadd.s32 4294967294, %s1429_s13  }
  0x27   : > { %1995 = sst [smem:[#allocation23_spill]] %s2049_s17  ;;  %p1582_p8 = por %p70_p6, %p69_p5 }
  0x28   : > { %p1588_p9 = por %p263_p7, %p63_p1  ;;  %s51_s24 = ssub.s32 %s1425_s30, %s2049_s17 }
  0x29   : > { %p269_p10 = scmp.eq.s32.totalorder %s1999_s12, 3  ;;  %s53_s11 = sor.u32 %s52_s19, %s51_s24 }
  0x2a   : > { %s1997_s16 = scalar_select %p1588_p9, 1, 0 }
  0x2b   : > { %p276_p11 = scmp.eq.s32.totalorder %s51_s24, 0  ;;  %p54_p12 = scmp.eq.s32.totalorder %s53_s11, 0 }
  0x2c   : > { %1998 = sst [smem:[#allocation24_spill]] %s1997_s16  ;;  %p1596_p13 = por %p269_p10, %p69_p5 }
  0x2d   : > { %s278_s10 = sadd.s32 1, %s1397_s23  ;;  %p288_p0 = scmp.ne.s32.totalorder %s1397_s23, %s1393_s22 }
  0x2e   : > { %s2000_s9 = scalar_select %p1596_p13, 1, 0 }
  0x2f   : > { %s1604_s28 = scalar_select %p54_p12, %s1409_s26, %s56_s18  }
  0x30   : > { %2001 = sst [smem:[#allocation25_spill]] %s2000_s9  ;;  %p1611_p1 = por %p288_p0, %p263_p7 }
  0x31   : > { %2002 = sst [smem:[#allocation26_spill]] %s1604_s28  ;;  %p294_p2 = scmp.ne.s32.totalorder %s1393_s22, %s1389_s21 }
  0x32   : > { %s1607_s7 = scalar_select %p276_p11, %s1397_s23, %s278_s10  }
  0x33   : > { %s2004_s17 = scalar_select %p1611_p1, 1, 0 }
  0x34   : > { %2003 = sst [smem:[#allocation27_spill]] %s1607_s7  ;;  %p1086_p4 = scmp.lt.s32.totalorder %s1429_s13, 4 }
  0x35   : > { %2005 = sst [smem:[#allocation28_spill]] %s2004_s17  ;;  %p1618_p6 = por %p294_p2, %p269_p10 }
  0x36   : > { %s391_s12 = sand.u32 1, %s1409_s26   ;;  %s1036_s19 = sshll.u32 %s1425_s30, 1 }
  0x37   : > { %s1035_s24 = sshll.u32 %s391_s12, 2  ;;  %s399_s18 = sadd.s32 %s1421_s29, %s1036_s19 }
  0x38   : > { %s395_s28 = scalar_lea.vmem [#allocation3], %s1035_s24  ;;  %s1037_s7 = sshll.u32 %s399_s18, 2 }
  0x39   : > { %s405_s10 = sshll.u32 %s395_s28, 4  ;;  %s2007_s0 = sld [smem:[#allocation29_spill]]  ;;  %s406_s10 = int_to_ptr.vmem [resolvable:$true] %s405_s10 }
  0x3a   : > { %p1070_p5 = pnand %p1086_p4, %p1572_p3  ;;  %p1038_p7 = scmp.ge.s32.totalorder %s1429_s13, 1 }
  0x3b   : > { %s392_s17 = scalar_lea.sflag [#allocation4], %s391_s12  ;;  %p410_p10 = scmp.lt.s32.totalorder %s1429_s13, 5 }
  0x3d   : > { %p411_p11 = pnand %p1038_p7, %p410_p10 }
  0x3e   : > { %s1633_s24 = sand.u32 (!%p411_p11), 1, %s1405_s25  }
  0x3f   : > { %s401_s16 = scalar_lea.hbm %s2007_s0, %s1037_s7  ;;  %414 = sbr.rel (%p411_p11) target bundleno = 765 (0x2fd), region = 56 }
  0x40   : > { %s403_s21 = sshll.u32 %s401_s16, 4  ;;  %s1039_s28 = sshll.u32 (!%p411_p11), %s1633_s24, 2  ;;  %s404_s21 = int_to_ptr.hbm [resolvable:$true] %s403_s21 }
  0x41   : > { %1072 = dma.hbm_to_vmem [thread:$0]  (!%p1070_p5), %s404_s21, 64, %s406_s10, %s392_s17  }
  0x42   : > { %s417_s19 = scalar_lea.sflag (!%p411_p11), [#allocation4], %s1633_s24  ;;  %s420_s9 = scalar_lea.vmem (!%p411_p11), [#allocation3], %s1039_s28 }
  0x44   : > { %1372 = dma.done.wait (%p1582_p8), %s417_s19, 64  }
  0x45   : > { %1374 = vsyncadd (%p1582_p8), %s417_s19, 4294967232  ;;  %s1040_s7 = sshll.u32 %s1633_s24, 6  ;;  %s1643_s21 = sand.u32 1, %s1393_s22  }
  0x46   : > { %s1645_s23 = scalar_lea.vmem [#allocation6], %s1040_s7  ;;  %s1970_s16 = scalar_lea.vmem [#allocation7], %s1643_s21 }
  0x47   : > { %p1041_p3 = scmp.ne.s32.totalorder %s1413_s27, 0 }
  0x49   : > { %477 = sbr.rel (%p1041_p3) target bundleno = 80 (0x50), region = 64 }
  0x4e   : > { %vm478_vm0 = vcmask 516096   ;;  %v1431_v0 = vmov 0.0  }
  0x4f   : > { %479 = vst.msk [vmem:[#allocation2] sm:$0x1] %vm478_vm0, %v1431_v0 }
  0x50 PF: > { %v480_v1 = vld [vmem:[%s420_s9] sm:$0xf]  ;;  %vm514_vm1 = vcmask 1043456   ;;  %s2008_s2 = sld [smem:[#allocation31_spill]]  ;;  %v1432_v4 = vmov 0   ;;  %vm489_vm2 = vcmask 31744  }
  0x51   : > { %s2009_s1 = sld [smem:[#allocation30_spill]]  ;;  %1182 = vset.pattern.permute.xlu0 %v1432_v4  ;;  %1042 = vmatpush.msk.msra.mxu0 %vm514_vm1, %v480_v1  ;;  %vm709_vm3 = vcmask 516096   ;;  %p1051_p8 = scmp.ne.s32.totalorder %s1413_s27, 1 }
  0x52   : > { %1058 = vmatpush.msk.msra.mxu2 %vm514_vm1, %v480_v1  ;;  %1183 = vset.pattern.permute.xlu1 %v1432_v4  ;;  %s2010_s3 = sld [smem:[#allocation32_spill]]  ;;  %s2016_s19 = scalar_lea.vmem (!%p1051_p8), [#allocation9], %s1643_s21 }
  0x53   : > { %1184 = vset.pattern.permute.xlu2 %v1432_v4  ;;  %s2011_s4 = sld [smem:[#allocation33_spill]] (!%p1051_p8)  ;;  %s2017_s17 = scalar_lea.vmem (!%p1051_p8), [#allocation10], %s1643_s21 }
  0x54   : > { %s2012_s8 = sld [smem:[#allocation37_spill]] (!%p1051_p8) }
  0x55   : > { %s2013_s5 = sld [smem:[#allocation34_spill]] (!%p1051_p8) }
  0x56   : > { %v566_v2 = vld [vmem:[%s2008_s2 + $0x38] sm:$0xff]  ;;  %v565_v6 = vld [vmem:[%s2008_s2 + $0x30] sm:$0xff]  ;;  %v564_v7 = vld [vmem:[%s2008_s2 + $0x28] sm:$0xff]  ;;  %s2014_s6 = sld [smem:[#allocation35_spill]] (!%p1051_p8) }
  0x57   : > { %v481_v3 = vld [vmem:[%s2009_s1] sm:$0xff]  ;;  %604 = vperm.xlu0 %1182, %v566_v2   ;;  %599 = vperm.xlu1 %1183, %v565_v6   ;;  %v482_v9 = vld [vmem:[%s2009_s1 + $0x8] sm:$0xff]  ;;  %v483_v14 = vld [vmem:[%s2009_s1 + $0x10] sm:$0xff]  ;;  %s2015_s28 = sld [smem:[#allocation36_spill]] (!%p1051_p8) }
  0x58   : > { %v485_v5 = vld [vmem:[%s2009_s1 + $0x20] sm:$0xff]  ;;  %1043 = vmatmul.msk.f32.vlgmr.msra.gmra.mxu0 %vm489_vm2, %v481_v3  ;;  %594 = vperm.xlu2 %1184, %v564_v7   ;;  %v622_v8 = vld [vmem:[%s2010_s3 + $0x38] sm:$0xff]  ;;  %v486_v10 = vld [vmem:[%s2009_s1 + $0x28] sm:$0xff] }
  0x59   : > { %1047 = vmatmul.msk.f32.vlgmr.msra.gmra.mxu2 %vm489_vm2, %v485_v5  ;;  %v621_v11 = vld [vmem:[%s2010_s3 + $0x30] sm:$0xff]  ;;  %v620_v12 = vld [vmem:[%s2010_s3 + $0x28] sm:$0xff]  ;;  %v563_v13 = vld [vmem:[%s2008_s2 + $0x20] sm:$0xff] }
  0x5a   : > { %v487_v15 = vld [vmem:[%s2009_s1 + $0x30] sm:$0xff]  ;;  %v619_v16 = vld [vmem:[%s2010_s3 + $0x20] sm:$0xff]  ;;  %v562_v17 = vld [vmem:[%s2008_s2 + $0x18] sm:$0xff] }
  0x5b   : > { %v618_v18 = vld [vmem:[%s2010_s3 + $0x18] sm:$0xff]  ;;  %v561_v21 = vld [vmem:[%s2008_s2 + $0x10] sm:$0xff]  ;;  %v560_v23 = vld [vmem:[%s2008_s2 + $0x8] sm:$0xff] }
  0x5c   : > { %v484_v19 = vld [vmem:[%s2009_s1 + $0x18] sm:$0xff]  ;;  %v617_v22 = vld [vmem:[%s2010_s3 + $0x10] sm:$0xff]  ;;  %v616_v24 = vld [vmem:[%s2010_s3 + $0x8] sm:$0xff] }
  0x5d   : > { %v488_v20 = vld [vmem:[%s2009_s1 + $0x38] sm:$0xff]  ;;  %v559_v25 = vld [vmem:[%s2008_s2] sm:$0xff] }
  0x5e   : > { %v615_v26 = vld [vmem:[%s2010_s3] sm:$0xff] }
  0x5f   : > { %660 = vperm.xlu0 %1182, %v622_v8   ;;  %655 = vperm.xlu1 %1183, %v621_v11   ;;  %v1433_v11 = vmov 1.0  }
  0x60   : > { %1044 = vmatmul.msk.f32.gmra.mxu0 %vm489_vm2, %v482_v9  ;;  %650 = vperm.xlu2 %1184, %v620_v12   ;;  %v687_v12 = vld [vmem:[#allocation2] sm:$0x1] }
  0x61   : > { %1048 = vmatmul.msk.f32.gmra.mxu2 %vm489_vm2, %v486_v10 }
  0x67   : > { %589 = vperm.xlu0 %1182, %v563_v13   ;;  %645 = vperm.xlu1 %1183, %v619_v16  }
  0x68   : > { %1045 = vmatmul.msk.f32.gmra.mxu0 %vm489_vm2, %v483_v14  ;;  %584 = vperm.xlu2 %1184, %v562_v17  }
  0x69   : > { %1049 = vmatmul.msk.f32.gmra.mxu2 %vm489_vm2, %v487_v15 }
  0x6f   : > { %640 = vperm.xlu0 %1182, %v618_v18   ;;  %579 = vperm.xlu1 %1183, %v561_v21  }
  0x70   : > { %1046 = vmatmul.msk.f32.gmra.mxu0 %vm489_vm2, %v484_v19  ;;  %635 = vperm.xlu2 %1184, %v617_v22  }
  0x71   : > { %1050 = vmatmul.msk.f32.gmra.mxu2 %vm489_vm2, %v488_v20 }
  0x77   : > { %574 = vperm.xlu0 %1182, %v560_v23   ;;  %630 = vperm.xlu1 %1183, %v616_v24  }
  0x78   : > { %569 = vperm.xlu2 %1184, %v559_v25  }
  0x7f   : > { %625 = vperm.xlu0 %1182, %v615_v26  }
  0xb2   : > { %v595_v27 = vpop.permute.xlu2 %594 }
  0xba   : > { %v651_v30 = vpop.permute.xlu2 %650 }
  0xc2   : > { %v585_v35 = vpop.permute.xlu2 %584 }
  0xc9   : > { %v605_v28 = vpop.permute.xlu0 %604  ;;  %v600_v29 = vpop.permute.xlu1 %599 }
  0xca   : > { %v636_v43 = vpop.permute.xlu2 %635 }
  0xd1   : > { %v661_v31 = vpop.permute.xlu0 %660  ;;  %v656_v32 = vpop.permute.xlu1 %655 }
  0xd2   : > { %v570_v58 = vpop.permute.xlu2 %569 }
  0xd5   : > { %v535_v33 = vpop.f32.mrf.mxu0 }
  0xd6   : > { %v607_v0 = vmul.f32 %v570_v58, %v535_v33 }
  0xd9   : > { %v590_v34 = vpop.permute.xlu0 %589  ;;  %v646_v38 = vpop.permute.xlu1 %645 }
  0xdc   : > { %v547_v36 = vpop.f32.mrf.mxu2 }
  0xdd   : > { %v611_v37 = vmul.f32 %v590_v34, %v547_v36  ;;  %v538_v39 = vpop.f32.mrf.mxu0 }
  0xdf   : > { %v667_v40 = vadd.f32 %v646_v38, %v611_v37 }
  0xe1   : > { %v675_v41 = vmax.f32 %v667_v40, 0.0  ;;  %v641_v42 = vpop.permute.xlu0 %640  ;;  %v580_v46 = vpop.permute.xlu1 %579 }
  0xe3   : > { %683 = vst [vmem:[%s1645_s23 + $0x20] sm:$0xff] %v675_v41 }
  0xe4   : > { %v550_v44 = vpop.f32.mrf.mxu2 }
  0xe5   : > { %v612_v45 = vmul.f32 %v595_v27, %v550_v44  ;;  %v541_v47 = vpop.f32.mrf.mxu0 }
  0xe6   : > { %v609_v48 = vmul.f32 %v580_v46, %v541_v47 }
  0xe7   : > { %v668_v49 = vadd.f32 %v651_v30, %v612_v45 }
  0xe8   : > { %v665_v51 = vadd.f32 %v636_v43, %v609_v48 }
  0xe9   : > { %v676_v50 = vmax.f32 %v668_v49, 0.0  ;;  %v575_v52 = vpop.permute.xlu0 %574  ;;  %v631_v57 = vpop.permute.xlu1 %630 }
  0xea   : > { %v608_v53 = vmul.f32 %v575_v52, %v538_v39  ;;  %v673_v54 = vmax.f32 %v665_v51, 0.0 }
  0xeb   : > { %684 = vst [vmem:[%s1645_s23 + $0x28] sm:$0xff] %v676_v50 }
  0xec   : > { %v553_v55 = vpop.f32.mrf.mxu2  ;;  %681 = vst [vmem:[%s1645_s23 + $0x10] sm:$0xff] %v673_v54  ;;  %v664_v59 = vadd.f32 %v631_v57, %v608_v53 }
  0xed   : > { %v613_v56 = vmul.f32 %v600_v29, %v553_v55  ;;  %v544_v60 = vpop.f32.mrf.mxu0 }
  0xee   : > { %v610_v61 = vmul.f32 %v585_v35, %v544_v60  ;;  %v672_v63 = vmax.f32 %v664_v59, 0.0 }
  0xef   : > { %v669_v62 = vadd.f32 %v656_v32, %v613_v56 }
  0xf0   : > { %v666_v2 = vadd.f32 %v641_v42, %v610_v61  ;;  %680 = vst [vmem:[%s1645_s23 + $0x8] sm:$0xff] %v672_v63 }
  0xf1   : > { %v677_v1 = vmax.f32 %v669_v62, 0.0  ;;  %v626_v3 = vpop.permute.xlu0 %625 }
  0xf2   : > { %v663_v4 = vadd.f32 %v626_v3, %v607_v0  ;;  %v674_v5 = vmax.f32 %v666_v2, 0.0 }
  0xf3   : > { %685 = vst [vmem:[%s1645_s23 + $0x30] sm:$0xff] %v677_v1 }
  0xf4   : > { %v556_v6 = vpop.f32.mrf.mxu2  ;;  %v671_v7 = vmax.f32 %v663_v4, 0.0  ;;  %682 = vst [vmem:[%s1645_s23 + $0x18] sm:$0xff] %v674_v5 }
  0xf5   : > { %v614_v8 = vmul.f32 %v605_v28, %v556_v6 }
  0xf6   : > { %679 = vst [vmem:[%s1645_s23] sm:$0xff] %v671_v7 }
  0xf7   : > { %v670_v9 = vadd.f32 %v661_v31, %v614_v8 }
  0xf9   : > { %v678_v10 = vmax.f32 %v670_v9, 0.0 }
  0xfb   : > { %686 = vst [vmem:[%s1645_s23 + $0x38] sm:$0xff] %v678_v10  ;;  %696 = vmatpush.xpose.msra.mxu1 %v678_v10 }
  0xff   : > { %697 = vmatpush.xpose.msra.mxu1 %v677_v1 }
 0x103   : > { %698 = vmatpush.xpose.msra.mxu1 %v676_v50 }
 0x107   : > { %699 = vmatpush.xpose.msra.mxu1 %v675_v41 }
 0x10b   : > { %700 = vmatpush.xpose.msra.mxu1 %v674_v5 }
 0x10f   : > { %701 = vmatpush.xpose.msra.mxu1 %v673_v54 }
 0x113   : > { %702 = vmatpush.xpose.msra.mxu1 %v672_v63 }
 0x117   : > { %703 = vmatpush.xpose.msra.mxu1 %v671_v7 }
 0x11a   : > { %704 = vmatmul.f32.vlgmr.msra.gmra.mxu1 %v1433_v11 }
 0x196   : > { %714 = sbr.rel (%p1051_p8) target bundleno = 688 (0x2b0), region = 68 }
 0x197   : > { %v705_v13 = vpop.f32.mrf.mxu1 }
 0x198   : > { %v708_v14 = vadd.f32 %v705_v13, %v687_v12 }
 0x19a   : > { %710 = vst.msk [vmem:[#allocation2] sm:$0x1] %vm709_vm3, %v708_v14 }
 0x19b   : > { %v725_v15 = vld [vmem:[%s2011_s4 + $0x38] sm:$0xff]  ;;  %v724_v16 = vld [vmem:[%s2011_s4 + $0x30] sm:$0xff]  ;;  %v723_v17 = vld [vmem:[%s2011_s4 + $0x28] sm:$0xff]  ;;  %vm727_vm4 = vcmask 523264  }
 0x19c   : > { %739 = vmatpush.msra.mxu0 %v725_v15  ;;  %v772_v20 = vld [vmem:[%s2012_s8 + $0x78] sm:$0xff]  ;;  %v771_v21 = vld [vmem:[%s2012_s8 + $0x70] sm:$0xff]  ;;  %v722_v22 = vld [vmem:[%s2011_s4 + $0x20] sm:$0xff] }
 0x19d   : > { %773 = vmatpush.msra.mxu1 %v772_v20  ;;  %v770_v23 = vld [vmem:[%s2012_s8 + $0x68] sm:$0xff]  ;;  %v721_v24 = vld [vmem:[%s2011_s4 + $0x18] sm:$0xff]  ;;  %v769_v25 = vld [vmem:[%s2012_s8 + $0x60] sm:$0xff] }
 0x19e   : > { %740 = vmatpush.msra.mxu0 %v724_v16  ;;  %v720_v26 = vld [vmem:[%s2011_s4 + $0x10] sm:$0xff]  ;;  %v768_v27 = vld [vmem:[%s2012_s8 + $0x58] sm:$0xff]  ;;  %v719_v28 = vld [vmem:[%s2011_s4 + $0x8] sm:$0xff] }
 0x19f   : > { %774 = vmatpush.msra.mxu1 %v771_v21  ;;  %v767_v29 = vld [vmem:[%s2012_s8 + $0x50] sm:$0xff]  ;;  %v718_v30 = vld [vmem:[%s2011_s4] sm:$0xff]  ;;  %v766_v31 = vld [vmem:[%s2012_s8 + $0x48] sm:$0xff] }
 0x1a0   : > { %741 = vmatpush.msra.mxu0 %v723_v17  ;;  %v765_v32 = vld [vmem:[%s2012_s8 + $0x40] sm:$0xff]  ;;  %v764_v33 = vld [vmem:[%s2012_s8 + $0x38] sm:$0xff]  ;;  %v763_v34 = vld [vmem:[%s2012_s8 + $0x30] sm:$0xff] }
 0x1a1   : > { %v715_v18 = vld [vmem:[#allocation2] sm:$0x1]  ;;  %775 = vmatpush.msra.mxu1 %v770_v23  ;;  %v762_v35 = vld [vmem:[%s2012_s8 + $0x28] sm:$0xff]  ;;  %v760_v37 = vld [vmem:[%s2012_s8 + $0x18] sm:$0xff] }
 0x1a2   : > { %v716_v19 = vmul.f32 0.00390625, %v715_v18  ;;  %742 = vmatpush.msra.mxu0 %v722_v22  ;;  %v761_v36 = vld [vmem:[%s2012_s8 + $0x20] sm:$0xff]  ;;  %v759_v38 = vld [vmem:[%s2012_s8 + $0x10] sm:$0xff]  ;;  %v758_v39 = vld [vmem:[%s2012_s8 + $0x8] sm:$0xff] }
 0x1a3   : > { %776 = vmatpush.msra.mxu1 %v769_v25  ;;  %v757_v40 = vld [vmem:[%s2012_s8] sm:$0xff] }
 0x1a4   : > { %717 = vst.msk [vmem:[%s1970_s16] sm:$0x1] %vm709_vm3, %v716_v19  ;;  %743 = vmatpush.msra.mxu0 %v721_v24  ;;  %v726_v41 = vld [vmem:[%s2013_s5] sm:$0x1] }
 0x1a5   : > { %777 = vmatpush.msra.mxu1 %v768_v27  ;;  %v751_v43 = vld [vmem:[%s2014_s6] sm:$0x1] }
 0x1a6   : > { %744 = vmatpush.msra.mxu0 %v720_v26  ;;  %v753_v45 = vld [vmem:[%s2015_s28] sm:$0x1] }
 0x1a7   : > { %778 = vmatpush.msra.mxu1 %v767_v29 }
 0x1a8   : > { %745 = vmatpush.msra.mxu0 %v719_v28 }
 0x1a9   : > { %779 = vmatpush.msra.mxu1 %v766_v31 }
 0x1aa   : > { %746 = vmatpush.msra.mxu0 %v718_v30 }
 0x1ab   : > { %1052 = vmatmul.msk.f32.vlgmr.msra.gmra.mxu0 %vm727_vm4, %v716_v19  ;;  %780 = vmatpush.msra.mxu1 %v765_v32 }
 0x1ad   : > { %781 = vmatpush.msra.mxu1 %v764_v33 }
 0x1af   : > { %782 = vmatpush.msra.mxu1 %v763_v34 }
 0x1b1   : > { %783 = vmatpush.msra.mxu1 %v762_v35 }
 0x1b3   : > { %784 = vmatpush.msra.mxu1 %v761_v36 }
 0x1b5   : > { %785 = vmatpush.msra.mxu1 %v760_v37 }
 0x1b7   : > { %786 = vmatpush.msra.mxu1 %v759_v38 }
 0x1b9   : > { %787 = vmatpush.msra.mxu1 %v758_v39 }
 0x1bb   : > { %788 = vmatpush.msra.mxu1 %v757_v40 }
 0x228   : > { %v748_v42 = vpop.f32.mrf.mxu0 }
 0x229   : > { %v749_v44 = vadd.f32 %v748_v42, %v726_v41 }
 0x22b   : > { %v752_v46 = vmul.f32 %v751_v43, %v749_v44 }
 0x22d   : > { %v754_v47 = vadd.f32 %v753_v45, %v752_v46 }
 0x22f   : > { %v755_v48 = vmax.f32 %v754_v47, 0.0 }
 0x231   : > { %756 = vst [vmem:[%s2016_s19] sm:$0x1] %v755_v48  ;;  %789 = vmatmul.f32.vlgmr.msra.gmra.mxu1 %v755_v48 }
 0x2ae   : > { %v790_v49 = vpop.f32.mrf.mxu1 }
 0x2af   : > { %793 = vst [vmem:[%s2017_s17] sm:$0x1] %v790_v49 }
 0x2b0 PF: > { %s2018_s20 = sld [smem:[#allocation19_spill]]  ;;  %s799_s7 = sand.u32 1, %s1558_s14  }
 0x2b1   : > { %s2020_s16 = sld [smem:[#allocation39_spill]]  ;;  %s2021_s10 = scalar_lea.vmem [#allocation7], %s1643_s21 }
 0x2b2   : > { %s836_s28 = sshll.u32 %s2021_s10, 4  ;;  %s1836_s19 = scalar_lea.sflag [#allocation8], %s799_s7  ;;  %s837_s28 = int_to_ptr.vmem [resolvable:$true] %s836_s28 }
 0x2b7   : > { %s834_s18 = scalar_lea.hbm %s2020_s16, %s2018_s20  ;;  %s1235_s3 = scalar_lea.hbm %s2020_s16, 2 }
 0x2b8   : > { %s838_s0 = sshll.u32 %s834_s18, 4  ;;  %s839_s0 = int_to_ptr.hbm [resolvable:$true] %s838_s0 }
 0x2b9   : > { %s1229_s1 = sshra.s32 %s839_s0, 4  ;;  %s1230_s1 = int_to_ptr.hbm [resolvable:$true] %s1229_s1 }
 0x2ba   : > { %s1231_s17 = scalar_lea.hbm %s1230_s1, 1  ;;  %p1236_p4 = scmp.lt.s32.totalorder %s1230_s1, %s2020_s16 }
 0x2bb   : > { %p1232_p12 = scmp.ne.s32.totalorder %s1230_s1, %s1231_s17  ;;  %p1237_p5 = scmp.lt.s32.totalorder %s1235_s3, %s1231_s17 }
 0x2bd   : > { %p1233_p0 = pnand %p1232_p12, %p1611_p1  ;;  %p1238_p7 = por %p1237_p5, %p1236_p4 }
 0x2bf   : > { %p1234_p2 = pneg %p1233_p0 }
 0x2c1   : > { %p1239_p10 = pnand %p1238_p7, %p1234_p2 }
 0x2c3   : > { %1242 = shalt.err (!%p1239_p10)
}
 0x2c4   : > { %1062 = dma.vmem_to_hbm [thread:$0]  (%p1611_p1), %s837_s28, 16, %s839_s0, %s1836_s19  }
 0x2c5   : > { %s1054_s2 = sshll.u32 %s2018_s20, 4  ;;  %s820_s18 = sshll.u32 %s1645_s23, 4  ;;  %s821_s18 = int_to_ptr.vmem [resolvable:$true] %s820_s18 }
 0x2c6   : > { %s817_s10 = sadd.s32 %s1413_s27, %s1054_s2  ;;  %s2023_s17 = sld [smem:[#allocation38_spill]] }
 0x2c7   : > { %s1055_s14 = sshll.u32 %s817_s10, 3  ;;  %s2024_s6 = sld [smem:[#allocation40_spill]] }
 0x2c8   : > { %s795_s16 = scalar_lea.sflag [#allocation5], %s1633_s24 }
 0x2cc   : > { %s819_s15 = scalar_lea.hbm %s2023_s17, %s1055_s14  ;;  %s1263_s23 = scalar_lea.hbm %s2023_s17, 256 }
 0x2cd   : > { %s822_s12 = sshll.u32 %s819_s15, 4  ;;  %s847_s8 = scalar_lea.hbm %s2024_s6, %s2018_s20  ;;  %s823_s12 = int_to_ptr.hbm [resolvable:$true] %s822_s12 }
 0x2ce   : > { %s1257_s30 = sshra.s32 %s823_s12, 4  ;;  %s1258_s30 = int_to_ptr.hbm [resolvable:$true] %s1257_s30 }
 0x2cf   : > { %s1259_s29 = scalar_lea.hbm %s1258_s30, 64  ;;  %p1264_p12 = scmp.lt.s32.totalorder %s1258_s30, %s2023_s17 }
 0x2d0   : > { %p1260_p11 = scmp.ne.s32.totalorder %s1258_s30, %s1259_s29  ;;  %p1265_p0 = scmp.lt.s32.totalorder %s1263_s23, %s1259_s29 }
 0x2d2   : > { %p1261_p3 = pnand %p1260_p11, %p1588_p9  ;;  %p1266_p2 = por %p1265_p0, %p1264_p12 }
 0x2d4   : > { %p1262_p8 = pneg %p1261_p3 }
 0x2d6   : > { %p1267_p4 = pnand %p1266_p2, %p1262_p8 }
 0x2d8   : > { %1270 = shalt.err (!%p1267_p4)
}
 0x2d9   : > { %s1434_s4 = smov 128   ;;  %s1435_s5 = smov 256  }
 0x2da   : > { %s1436_s24 = smov 8   ;;  %s2025_s10 = scalar_lea.vmem [#allocation9], %s1643_s21 }
 0x2db   : > { %1061 = dma.vmem_to_hbm [thread:$0]  (%p1588_p9), %s821_s18, 1024, %s823_s12, %s795_s16, %s1434_s4, %s1435_s5, %s1436_s24  }
 0x2dc   : > { %s849_s14 = sshll.u32 %s2025_s10, 4  ;;  %s851_s1 = sshll.u32 %s847_s8, 4  ;;  %s850_s14 = int_to_ptr.vmem [resolvable:$true] %s849_s14  ;;  %s852_s1 = int_to_ptr.hbm [resolvable:$true] %s851_s1 }
 0x2dd   : > { %s1285_s3 = sshra.s32 %s852_s1, 4  ;;  %s1291_s0 = scalar_lea.hbm %s2024_s6, 2  ;;  %s1286_s3 = int_to_ptr.hbm [resolvable:$true] %s1285_s3 }
 0x2de   : > { %s1287_s30 = scalar_lea.hbm %s1286_s3, 1  ;;  %p1292_p9 = scmp.lt.s32.totalorder %s1286_s3, %s2024_s6 }
 0x2df   : > { %p1288_p5 = scmp.ne.s32.totalorder %s1286_s3, %s1287_s30  ;;  %p1293_p11 = scmp.lt.s32.totalorder %s1291_s0, %s1287_s30 }
 0x2e1   : > { %p1289_p7 = pnand %p1288_p5, %p1611_p1  ;;  %p1294_p3 = por %p1293_p11, %p1292_p9 }
 0x2e3   : > { %p1290_p10 = pneg %p1289_p7 }
 0x2e5   : > { %p1295_p8 = pnand %p1294_p3, %p1290_p10 }
 0x2e7   : > { %1298 = shalt.err (!%p1295_p8)
}
 0x2e8   : > { %1063 = dma.vmem_to_hbm [thread:$0]  (%p1611_p1), %s850_s14, 16, %s852_s1, %s1836_s19  }
 0x2e9   : > { %s2026_s7 = sld [smem:[#allocation41_spill]]  ;;  %s2027_s12 = scalar_lea.vmem [#allocation10], %s1643_s21 }
 0x2ea   : > { %s862_s28 = sshll.u32 %s2027_s12, 4  ;;  %s808_s4 = scalar_lea.sflag [#allocation11], %s1643_s21  ;;  %s863_s28 = int_to_ptr.vmem [resolvable:$true] %s862_s28 }
 0x2ef   : > { %s860_s18 = scalar_lea.hbm %s2026_s7, %s2018_s20  ;;  %s1319_s19 = scalar_lea.hbm %s2026_s7, 2 }
 0x2f0   : > { %s864_s2 = sshll.u32 %s860_s18, 4  ;;  %s865_s2 = int_to_ptr.hbm [resolvable:$true] %s864_s2 }
 0x2f1   : > { %s1313_s5 = sshra.s32 %s865_s2, 4  ;;  %s1314_s5 = int_to_ptr.hbm [resolvable:$true] %s1313_s5 }
 0x2f2   : > { %s1315_s24 = scalar_lea.hbm %s1314_s5, 1  ;;  %p1320_p4 = scmp.lt.s32.totalorder %s1314_s5, %s2026_s7 }
 0x2f3   : > { %p1316_p12 = scmp.ne.s32.totalorder %s1314_s5, %s1315_s24  ;;  %p1321_p5 = scmp.lt.s32.totalorder %s1319_s19, %s1315_s24 }
 0x2f5   : > { %p1317_p0 = pnand %p1316_p12, %p1611_p1  ;;  %p1322_p7 = por %p1321_p5, %p1320_p4 }
 0x2f7   : > { %p1318_p2 = pneg %p1317_p0 }
 0x2f9   : > { %p1323_p10 = pnand %p1322_p7, %p1318_p2 }
 0x2fb   : > { %1326 = shalt.err (!%p1323_p10)
}
 0x2fc   : > { %1064 = dma.vmem_to_hbm [thread:$0]  (%p1611_p1), %s863_s28, 16, %s865_s2, %s808_s4  }
 0x2fd PF: > { %s2028_s21 = sld [smem:[#allocation18_spill]]  ;;  %p1087_p9 = scmp.ge.s32.totalorder %s1429_s13, 2 }
 0x2ff   : > { %p1074_p11 = pnand %p1087_p9, %p1596_p13 }
 0x301   : > { %p1075_p3 = pneg %p1074_p11 }
 0x303   : > { %s876_s30 = sand.u32 1, %s2028_s21  }
 0x304   : > { %s877_s29 = scalar_lea.sflag [#allocation5], %s876_s30 }
 0x305   : > { %1376 = dma.done.wait (%p1075_p3), %s877_s29, 1024  }
 0x306   : > { %1378 = vsyncadd (%p1075_p3), %s877_s29, 4294966272  ;;  %s2030_s15 = sadd.s32 4294967294, %s1429_s13   ;;  %p1077_p8 = pnand %p1087_p9, %p1618_p6 }
 0x307   : > { %s886_s0 = sand.u32 1, %s2030_s15  }
 0x308   : > { %p1078_p12 = pneg %p1077_p8  ;;  %s887_s9 = scalar_lea.sflag [#allocation8], %s886_s0 }
 0x30a   : > { %1380 = dma.done.wait (%p1078_p12), %s887_s9, 32  }
 0x30b   : > { %1382 = vsyncadd (%p1078_p12), %s887_s9, 4294967264  ;;  %s2031_s27 = sld [smem:[#allocation16_spill]] }
 0x311   : > { %s904_s23 = sand.u32 1, %s2031_s27  }
 0x312   : > { %s905_s8 = scalar_lea.sflag [#allocation11], %s904_s23 }
 0x313   : > { %1384 = dma.done.wait (%p1078_p12), %s905_s8, 16  }
 0x314   : > { %1386 = vsyncadd (%p1078_p12), %s905_s8, 4294967280  ;;  %s35_s13 = sadd.s32 1, %s1429_s13   ;;  %s2032_s16 = sld [smem:[#allocation17_spill]] }
 0x315   : > { %p32_p13 = scmp.ge.s32.totalorder %s35_s13, 6   ;;  %s2033_s23 = sld [smem:[#allocation27_spill]] }
 0x316   : > { %s2034_s18 = sld [smem:[#allocation26_spill]]  ;;  %s2039_s21 = smov %s1393_s22 }
 0x317   : > { %s2035_s27 = sld [smem:[#allocation20_spill]]  ;;  %s2041_s24 = smov %s1405_s25 }
 0x318   : > { %s2036_s28 = sld [smem:[#allocation21_spill]]  ;;  %s2042_s25 = smov %s1409_s26 }
 0x319   : > { %s2037_s29 = sld [smem:[#allocation22_spill]]  ;;  %34 = sbr.rel (!%p32_p13) target bundleno = 27 (0x1b), region = 158 }
 0x31a   : > { %s2038_s30 = sld [smem:[#allocation23_spill]]  ;;  %s2040_s22 = smov %s2032_s16 }
 0x31c   : > { %s2043_s26 = smov %s2034_s18 }
 0x31e   :  { %910 = vsyncpa [#allocation4], 1 }
 0x31f   :  { %912 = vsyncpa [#allocation4 + $0x1], 1 }
 0x320   :  { %913 = vsyncpa [#allocation5], 1 }
 0x321   :  { %915 = vsyncpa [#allocation5 + $0x1], 1 }
 0x322   :  { %916 = vsyncpa [#allocation8], 1 }
 0x323   :  { %918 = vsyncpa [#allocation8 + $0x1], 1 }
 0x324   :  { %919 = vsyncpa [#allocation11], 1 }
 0x325   :  { %921 = vsyncpa [#allocation11 + $0x1], 1 }

</bundles_post_ra>
